<compile_context>
chip_gen: v7x
topology: tpu7x:2x2x1
jax: 0.10.0
libtpu: 0.0.40
codegen_flags: <defaults>
</compile_context>

<pallas_src>
import jax
import jax.numpy as jnp
from jax.experimental import pallas as pl
from jax.experimental.pallas import tpu as pltpu

_LANE = 1024        # lane-dense last dim (multiple of 128)
_TILE_ROWS = 512    # 512 x 1024 x 4B = 2 MiB per f32 tile


def _brightness_kernel(factor_ref, x_ref, o_ref):
    # factor_ref: SMEM scalar (shape (1,)), x_ref/o_ref: VMEM tiles.
    f = factor_ref[0]
    y = x_ref[...].astype(jnp.float32) * f
    o_ref[...] = jnp.clip(y, 0.0, 1.0).astype(o_ref.dtype)


def brightness_forward(x: jax.Array, factor: jax.Array) -> jax.Array:
    """Apply brightness jitter: clamp(x * factor, 0, 1). Works for any shape; NCHW expected."""
    orig_shape = x.shape
    total = int(x.size)

    # Lane-dense flattening: (padded_rows, _LANE) with padded_rows a multiple of tile_rows.
    rows = pl.cdiv(total, _LANE)
    tile_rows = min(_TILE_ROWS, max(8, pl.cdiv(rows, 8) * 8))  # multiple of 8, capped
    padded_rows = pl.cdiv(rows, tile_rows) * tile_rows
    padded_total = padded_rows * _LANE

    xf = x.reshape(-1)
    if padded_total != total:
        xf = jnp.pad(xf, (0, padded_total - total))
    x2d = xf.reshape(padded_rows, _LANE)

    grid = (padded_rows // tile_rows,)
    itemsize = jnp.dtype(x.dtype).itemsize

    out2d = pl.pallas_call(
        _brightness_kernel,
        out_shape=jax.ShapeDtypeStruct(x2d.shape, x2d.dtype),
        grid=grid,
        in_specs=[
            pl.BlockSpec(memory_space=pltpu.MemorySpace.SMEM),       # scalar factor
            pl.BlockSpec((tile_rows, _LANE), lambda i: (i, 0)),      # row-tile of image
        ],
        out_specs=pl.BlockSpec((tile_rows, _LANE), lambda i: (i, 0)),
        compiler_params=pltpu.CompilerParams(
            dimension_semantics=("parallel",),
        ),
        cost_estimate=pl.CostEstimate(
            flops=2 * padded_total,            # mul + clip
            transcendentals=0,
            bytes_accessed=2 * padded_total * itemsize,
        ),
    )(factor, x2d)

    return out2d.reshape(-1)[:total].reshape(orig_shape)


class Brightness:
    """JAX/Pallas port of the PyTorch Brightness module."""

    def __init__(self, outsize=(64, 64)):
        self.output_size = outsize
        self.brightness_range = (0.1, 1.9)

    def __call__(self, x: jax.Array, key: jax.Array) -> jax.Array:
        lo, hi = self.brightness_range
        factor = jax.random.uniform(
            key, shape=(1,), dtype=jnp.float32, minval=lo, maxval=hi
        )
        return brightness_forward(x, factor)


if __name__ == "__main__":
    key = jax.random.PRNGKey(0)
    k_img, k_factor = jax.random.split(key)

    # Small NCHW float image in [0, 1], consistent with an image-augmentation module.
    x = jax.random.uniform(k_img, (2, 4, 16, 16), dtype=jnp.float32)

    mod = Brightness(outsize=(16, 16))
    y = mod(x, k_factor)
    y = jax.block_until_ready(y)

    # Reference check in plain JAX.
    factor = jax.random.uniform(
        k_factor, shape=(1,), dtype=jnp.float32, minval=0.1, maxval=1.9
    )
    y_ref = jnp.clip(x * factor[0], 0.0, 1.0)
    assert y.shape == x.shape and y.dtype == x.dtype
    assert jnp.allclose(y, y_ref, atol=1e-6), "mismatch vs reference"

    print("KERNEL_OK")
</pallas_src>

<mosaic_0001>
module attributes {stable_mosaic.version = 11 : i64} {
  func.func @_brightness_kernel(%arg0: i32, %arg1: memref<1xf32, #tpu.memory_space<smem>>, %arg2: memref<8x1024xf32, #tpu.memory_space<vmem>>, %arg3: memref<8x1024xf32, #tpu.memory_space<vmem>>) attributes {dimension_semantics = [#tpu.dimension_semantics<parallel>], iteration_bounds = array<i64: 1>, scalar_prefetch = 0 : i64, scratch_operands = 0 : i64, tpu.core_type = #tpu.core_type<tc>, window_params = [{transform_indices = @transform_0, window_bounds = array<i64: 1>}, {transform_indices = @transform_1, window_bounds = array<i64: 8, 1024>}, {transform_indices = @transform_2, window_bounds = array<i64: 8, 1024>}]} {
    %c0 = arith.constant 0 : index
    %0 = memref.load %arg1[%c0] : memref<1xf32, #tpu.memory_space<smem>>
    %c0_0 = arith.constant 0 : index
    %c0_1 = arith.constant 0 : index
    %1 = vector.load %arg2[%c0_0, %c0_1] : memref<8x1024xf32, #tpu.memory_space<vmem>>, vector<8x1024xf32>
    %2 = vector.broadcast %0 : f32 to vector<8x1024xf32>
    %3 = arith.mulf %1, %2 : vector<8x1024xf32>
    %cst = arith.constant 0.000000e+00 : f32
    %cst_2 = arith.constant 1.000000e+00 : f32
    %4 = vector.broadcast %cst : f32 to vector<8x1024xf32>
    %5 = arith.maximumf %4, %3 : vector<8x1024xf32>
    %6 = vector.broadcast %cst_2 : f32 to vector<8x1024xf32>
    %7 = arith.minimumf %6, %5 : vector<8x1024xf32>
    %c0_3 = arith.constant 0 : index
    %c0_4 = arith.constant 0 : index
    %8 = vector.load %arg3[%c0_3, %c0_4] : memref<8x1024xf32, #tpu.memory_space<vmem>>, vector<8x1024xf32>
    tpu.vector_store %arg3[%c0_3, %c0_4], %7 {strides = array<i32>} : memref<8x1024xf32, #tpu.memory_space<vmem>>, vector<8x1024xf32>,
    return
  }
  func.func @transform_0(%arg0: i32) -> i32 {
    %c0_i32 = arith.constant 0 : i32
    %c0_i32_0 = arith.constant 0 : i32
    return %c0_i32 : i32
  }
  func.func @transform_1(%arg0: i32) -> (i32, i32) {
    %c0_i32 = arith.constant 0 : i32
    %c0_i32_0 = arith.constant 0 : i32
    return %arg0, %c0_i32 : i32, i32
  }
  func.func @transform_2(%arg0: i32) -> (i32, i32) {
    %c0_i32 = arith.constant 0 : i32
    %c0_i32_0 = arith.constant 0 : i32
    return %arg0, %c0_i32 : i32, i32
  }
}

</mosaic_0001>

<bundles_post_ra>
// kernel: tpu_custom_call.1
= control target key start
LH: loop header
LB: loop body
LE: loop exit
PB: predicated region body
PF: predicated region fallthrough
CT: control target
= control target key end

     0   :  { %8 = vsyncpa [#allocation4], 0  ;;  %s176_s0 = inlined_call_operand.<no memory space> [shape: f32[1], index: 0, kind: input, shape index: {}]   ;;  %s177_s1 = inlined_call_operand.hbm [shape: f32[8,1024], index: 1, kind: input, shape index: {}]   ;;  %s178_s2 = inlined_call_operand.hbm [shape: f32[8,1024], index: 2, kind: output, shape index: {}]  }
   0x1   :  { %9 = vsyncpa [#allocation5], 0  ;;  %s132_s9 = smov [#allocation3]   ;;  %s84_s13 = scalar_lea.hbm %s177_s1, 1024 }
   0x2   :  { %s18_s10 = sshll.u32 %s132_s9, 4  ;;  %p85_p0 = scmp.ne.s32.totalorder %s177_s1, %s84_s13  ;;  %s19_s10 = int_to_ptr.vmem [resolvable:$true] %s18_s10 }
   0x3   :  { %p88_p1 = scmp.lt.u32.totalorder %s84_s13, %s177_s1 }
   0x5   :  { %p90_p2 = pnand %p88_p1, %p85_p0 }
   0x7   :  { %93 = shalt.err (!%p90_p2)
}
   0x8   :  { %s94_s18 = scalar_lea.vmem %s19_s10, 1024  ;;  %p99_p4 = scmp.lt.s32.totalorder %s19_s10, %s19_s10 }
   0x9   :  { %p95_p3 = scmp.ne.s32.totalorder %s19_s10, %s94_s18  ;;  %p100_p5 = scmp.lt.s32.totalorder %s94_s18, %s94_s18 }
   0xb   :  { %p101_p6 = por %p100_p5, %p99_p4 }
   0xd   :  { %p102_p7 = pnand %p101_p6, %p95_p3 }
   0xf   :  { %105 = shalt.err (!%p102_p7)
}
  0x10   :  { %21 = dma.hbm_to_vmem [thread:$0]  %s177_s1, 1024, %s19_s10, [#allocation4]  }
  0x11   :  { %128 = dma.done.wait [#allocation4], 1024  }
  0x12   :  { %129 = vsyncadd [#allocation4], 4294966272  ;;  %v34_v0 = vstv %s176_s0  ;;  %v26_v1 = vld [vmem:[#allocation3] sm:$0xff]  ;;  %v27_v2 = vld [vmem:[#allocation3 + $0x8] sm:$0xff]  ;;  %s133_s0 = smov [#allocation6]  }
  0x13   :  { %v28_v3 = vld [vmem:[#allocation3 + $0x10] sm:$0xff]  ;;  %v35_v4 = vmul.f32 %v34_v0, %v26_v1  ;;  %v36_v5 = vmul.f32 %v34_v0, %v27_v2  ;;  %v29_v7 = vld [vmem:[#allocation3 + $0x18] sm:$0xff]  ;;  %v30_v8 = vld [vmem:[#allocation3 + $0x20] sm:$0xff]  ;;  %s73_s1 = sshll.u32 %s133_s0, 4  ;;  %s74_s1 = int_to_ptr.vmem [resolvable:$true] %s73_s1 }
  0x14   :  { %v37_v6 = vmul.f32 %v34_v0, %v28_v3  ;;  %v31_v9 = vld [vmem:[#allocation3 + $0x28] sm:$0xff]  ;;  %v38_v10 = vmul.f32 %v34_v0, %v29_v7  ;;  %v39_v11 = vmul.f32 %v34_v0, %v30_v8  ;;  %v32_v13 = vld [vmem:[#allocation3 + $0x30] sm:$0xff]  ;;  %v33_v14 = vld [vmem:[#allocation3 + $0x38] sm:$0xff]  ;;  %s106_s23 = scalar_lea.vmem %s74_s1, 1024  ;;  %p111_p9 = scmp.lt.s32.totalorder %s74_s1, %s74_s1 }
  0x15   :  { %v40_v12 = vmul.f32 %v34_v0, %v31_v9  ;;  %v43_v15 = vmax.f32 %v35_v4, 0.0  ;;  %v44_v16 = vmax.f32 %v36_v5, 0.0  ;;  %v41_v18 = vmul.f32 %v34_v0, %v32_v13  ;;  %p107_p8 = scmp.ne.s32.totalorder %s74_s1, %s106_s23  ;;  %p112_p10 = scmp.lt.s32.totalorder %s106_s23, %s106_s23 }
  0x16   :  { %v45_v17 = vmax.f32 %v37_v6, 0.0  ;;  %v46_v19 = vmax.f32 %v38_v10, 0.0  ;;  %v47_v20 = vmax.f32 %v39_v11, 0.0  ;;  %v42_v22 = vmul.f32 %v34_v0, %v33_v14 }
  0x17   :  { %v48_v21 = vmax.f32 %v40_v12, 0.0  ;;  %v51_v23 = vmin.f32 %v43_v15, 1.0  ;;  %v52_v24 = vmin.f32 %v44_v16, 1.0  ;;  %v49_v26 = vmax.f32 %v41_v18, 0.0  ;;  %p113_p11 = por %p112_p10, %p111_p9 }
  0x18   :  { %v53_v25 = vmin.f32 %v45_v17, 1.0  ;;  %v54_v27 = vmin.f32 %v46_v19, 1.0  ;;  %v55_v28 = vmin.f32 %v47_v20, 1.0  ;;  %v50_v30 = vmax.f32 %v42_v22, 0.0 }
  0x19   :  { %v56_v29 = vmin.f32 %v48_v21, 1.0  ;;  %59 = vst [vmem:[#allocation6] sm:$0xff] %v51_v23  ;;  %60 = vst [vmem:[#allocation6 + $0x8] sm:$0xff] %v52_v24  ;;  %v57_v31 = vmin.f32 %v49_v26, 1.0  ;;  %p114_p12 = pnand %p113_p11, %p107_p8 }
  0x1a   :  { %61 = vst [vmem:[#allocation6 + $0x10] sm:$0xff] %v53_v25  ;;  %62 = vst [vmem:[#allocation6 + $0x18] sm:$0xff] %v54_v27  ;;  %v58_v32 = vmin.f32 %v50_v30, 1.0 }
  0x1b   :  { %63 = vst [vmem:[#allocation6 + $0x20] sm:$0xff] %v55_v28  ;;  %64 = vst [vmem:[#allocation6 + $0x28] sm:$0xff] %v56_v29 }
  0x1c   :  { %65 = vst [vmem:[#allocation6 + $0x30] sm:$0xff] %v57_v31  ;;  %66 = vst [vmem:[#allocation6 + $0x38] sm:$0xff] %v58_v32 }
  0x1d   :  { %117 = shalt.err (!%p114_p12)
}
  0x1e   :  { %s118_s26 = scalar_lea.hbm %s178_s2, 1024 }
  0x1f   :  { %p119_p13 = scmp.ne.s32.totalorder %s178_s2, %s118_s26  ;;  %p122_p0 = scmp.lt.u32.totalorder %s118_s26, %s178_s2 }
  0x21   :  { %p124_p1 = pnand %p122_p0, %p119_p13 }
  0x23   :  { %127 = shalt.err (!%p124_p1)
}
  0x24   :  { %76 = dma.vmem_to_hbm [thread:$0]  %s74_s1, 1024, %s178_s2, [#allocation5]  }
  0x25   :  { %130 = dma.done.wait [#allocation5], 1024  }
  0x26   :  { %131 = vsyncadd [#allocation5], 4294966272 }
  0x27   :  { %80 = vsyncpa [#allocation4], 1 }
  0x28   :  { %81 = vsyncpa [#allocation5], 1 }

</bundles_post_ra>
